<compile_context>
chip_gen: v7x
topology: tpu7x:2x2x1
jax: 0.10.0
libtpu: 0.0.40
codegen_flags: <defaults>
</compile_context>

<pallas_src>
import functools

import jax
import jax.numpy as jnp
from jax.experimental import pallas as pl
from jax.experimental.pallas import tpu as pltpu


def _round_up(a: int, b: int) -> int:
    return (a + b - 1) // b * b


# ---------------------------------------------------------------------------
# Kernel 1: one-shot Bayesian weight sample (reparameterization trick).
#   sigma = softplus(rho);  W_t = (mu + sigma * eps)   with inputs already
#   transposed to [in_dim, out_dim] so the matmul kernel needs no XLU transpose.
# Runs over the weight exactly once (single grid point), so the transcendental
# cost is paid once, not per node tile.
# ---------------------------------------------------------------------------
def sample_weight_kernel(mu_ref, rho_ref, eps_ref, w_ref):
    rho = rho_ref[...]
    # Numerically stable softplus: max(x, 0) + log1p(exp(-|x|)), f32 VPU/EUP.
    sigma = jnp.maximum(rho, 0.0) + jnp.log1p(jnp.exp(-jnp.abs(rho)))
    w_ref[...] = (mu_ref[...] + sigma * eps_ref[...]).astype(w_ref.dtype)


def sample_weight(w_mu_t, w_rho_t, eps_t, *, compute_dtype):
    """W_t = mu_t + softplus(rho_t) * eps_t, emitted once in compute_dtype."""
    in_dim, out_dim = w_mu_t.shape
    spec = pl.BlockSpec((in_dim, out_dim), lambda i: (0, 0))  # full-array block
    return pl.pallas_call(
        sample_weight_kernel,
        out_shape=jax.ShapeDtypeStruct((in_dim, out_dim), compute_dtype),
        grid=(1,),
        in_specs=[spec, spec, spec],
        out_specs=spec,
    )(w_mu_t, w_rho_t, eps_t)


# ---------------------------------------------------------------------------
# Kernel 2: node-parallel matmul  h_tile = x_tile @ W_t  (bf16 MXU, f32 acc).
# x is streamed in tile_n-row blocks; W_t is VMEM-resident (constant index_map).
# ---------------------------------------------------------------------------
def node_matmul_kernel(x_ref, w_ref, o_ref, *, compute_dtype):
    x = x_ref[...].astype(compute_dtype)
    o_ref[...] = jnp.dot(
        x, w_ref[...], preferred_element_type=jnp.float32
    ).astype(o_ref.dtype)


def node_apply_forward(x, w_mu, w_rho, eps, *, tile_n=512, compute_dtype=jnp.bfloat16):
    """h = x @ (w_mu + softplus(w_rho) * eps).T  -- BayesianLinear, no bias."""
    n, in_dim = x.shape
    out_dim = w_mu.shape[0]
    assert w_mu.shape == (out_dim, in_dim)
    assert w_rho.shape == (out_dim, in_dim)
    assert eps.shape == (out_dim, in_dim)

    # One-shot sample of the transposed weight in bf16 (weight-sized work only).
    # The host-side .T is layout plumbing on the small weight, not the N-stream.
    w_t = sample_weight(w_mu.T, w_rho.T, eps.T, compute_dtype=compute_dtype)

    # Node tile: multiple of 8 (sublane), no larger than the (rounded-up) node
    # count.  Feature dims are left at their true sizes (block dim == array dim
    # is always legal), so there is no host-side padding and no output slice.
    tile_n = max(8, min(_round_up(tile_n, 8), _round_up(n, 8)))
    grid = (pl.cdiv(n, tile_n),)  # tail block (if any) is masked on writeback

    kernel = functools.partial(node_matmul_kernel, compute_dtype=compute_dtype)

    # Output dtype follows x; if the surrounding GCN runs bf16, pass bf16 x and
    # this kernel halves its dominant HBM traffic with no extra cast pass.
    return pl.pallas_call(
        kernel,
        out_shape=jax.ShapeDtypeStruct((n, out_dim), x.dtype),
        grid=grid,
        in_specs=[
            pl.BlockSpec((tile_n, in_dim), lambda i: (i, 0)),    # x: node-tiled
            pl.BlockSpec((in_dim, out_dim), lambda i: (0, 0)),   # W_t: resident
        ],
        out_specs=pl.BlockSpec((tile_n, out_dim), lambda i: (i, 0)),
        compiler_params=pltpu.CompilerParams(
            # Node blocks are independent -> shards across v7x's 2 TensorCores.
            dimension_semantics=("parallel",),
        ),
    )(x, w_t)


if __name__ == "__main__":
    # Small, NodeApplyModule-consistent shapes: N graph nodes with in_dim features.
    N, in_dim, out_dim = 48, 32, 16

    key = jax.random.PRNGKey(0)
    k_x, k_mu, k_rho, k_eps = jax.random.split(key, 4)

    # Node features h: [N, in_dim]
    x = jax.random.normal(k_x, (N, in_dim), dtype=jnp.float32)

    # Deterministic Bayesian-linear parameter init (synthetic, no checkpoint):
    #   weight_mu  ~ N(0, 0.1)   [out_dim, in_dim]
    #   weight_rho ~ U(-5, -4)   [out_dim, in_dim]   (typical BBP init)
    w_mu = 0.1 * jax.random.normal(k_mu, (out_dim, in_dim), dtype=jnp.float32)
    w_rho = jax.random.uniform(
        k_rho, (out_dim, in_dim), minval=-5.0, maxval=-4.0, dtype=jnp.float32
    )
    # Reparameterization noise eps ~ N(0, 1), drawn once deterministically
    # (host-side for reproducibility; it now costs a single weight-sized DMA
    # into the one-shot sampling kernel, not a per-tile stream).
    eps = jax.random.normal(k_eps, (out_dim, in_dim), dtype=jnp.float32)

    # Small tile_n to exercise a multi-step node grid at this toy size.
    h = node_apply_forward(x, w_mu, w_rho, eps, tile_n=16)
    jax.block_until_ready(h)

    # Pure-JAX f32 reference of the same semantics (kernel uses bf16 MXU operands
    # with f32 accumulation, hence the relaxed tolerance).
    sigma_ref = jnp.maximum(w_rho, 0.0) + jnp.log1p(jnp.exp(-jnp.abs(w_rho)))
    w_ref = w_mu + sigma_ref * eps
    h_ref = x @ w_ref.T
    assert h.shape == (N, out_dim)
    assert jnp.allclose(h, h_ref, atol=3e-2, rtol=3e-2), (
        float(jnp.max(jnp.abs(h - h_ref)))
    )

    print("KERNEL_OK")
</pallas_src>

<mosaic_0001>
module attributes {stable_mosaic.version = 11 : i64} {
  func.func @sample_weight_kernel(%arg0: i32, %arg1: memref<32x16xf32, #tpu.memory_space<vmem>>, %arg2: memref<32x16xf32, #tpu.memory_space<vmem>>, %arg3: memref<32x16xf32, #tpu.memory_space<vmem>>, %arg4: memref<32x16xbf16, #tpu.memory_space<vmem>>) attributes {dimension_semantics = [#tpu.dimension_semantics<arbitrary>], iteration_bounds = array<i64: 1>, scalar_prefetch = 0 : i64, scratch_operands = 0 : i64, tpu.core_type = #tpu.core_type<tc>, window_params = [{pipeline_mode = #tpu.pipeline_mode<synchronous>, transform_indices = @transform_0, window_bounds = array<i64: 32, 16>}, {pipeline_mode = #tpu.pipeline_mode<synchronous>, transform_indices = @transform_1, window_bounds = array<i64: 32, 16>}, {pipeline_mode = #tpu.pipeline_mode<synchronous>, transform_indices = @transform_2, window_bounds = array<i64: 32, 16>}, {pipeline_mode = #tpu.pipeline_mode<synchronous>, transform_indices = @transform_3, window_bounds = array<i64: 32, 16>}]} {
    %c0 = arith.constant 0 : index
    %c0_0 = arith.constant 0 : index
    %0 = vector.load %arg2[%c0, %c0_0] : memref<32x16xf32, #tpu.memory_space<vmem>>, vector<32x16xf32>
    %cst = arith.constant 0.000000e+00 : f32
    %1 = vector.broadcast %cst : f32 to vector<32x16xf32>
    %2 = arith.maximumf %0, %1 : vector<32x16xf32>
    %3 = math.absf %0 : vector<32x16xf32>
    %cst_1 = arith.constant 0.000000e+00 : f32
    %4 = vector.broadcast %cst_1 : f32 to vector<32x16xf32>
    %5 = arith.subf %4, %3 : vector<32x16xf32>
    %6 = math.exp %5 : vector<32x16xf32>
    %7 = math.log1p %6 : vector<32x16xf32>
    %8 = arith.addf %2, %7 : vector<32x16xf32>
    %c0_2 = arith.constant 0 : index
    %c0_3 = arith.constant 0 : index
    %9 = vector.load %arg1[%c0_2, %c0_3] : memref<32x16xf32, #tpu.memory_space<vmem>>, vector<32x16xf32>
    %c0_4 = arith.constant 0 : index
    %c0_5 = arith.constant 0 : index
    %10 = vector.load %arg3[%c0_4, %c0_5] : memref<32x16xf32, #tpu.memory_space<vmem>>, vector<32x16xf32>
    %11 = arith.mulf %8, %10 : vector<32x16xf32>
    %12 = arith.addf %9, %11 : vector<32x16xf32>
    %13 = arith.truncf %12 : vector<32x16xf32> to vector<32x16xbf16>
    %c0_6 = arith.constant 0 : index
    %c0_7 = arith.constant 0 : index
    %14 = vector.load %arg4[%c0_6, %c0_7] : memref<32x16xbf16, #tpu.memory_space<vmem>>, vector<32x16xbf16>
    tpu.vector_store %arg4[%c0_6, %c0_7], %13 {strides = array<i32>} : memref<32x16xbf16, #tpu.memory_space<vmem>>, vector<32x16xbf16>,
    return
  }
  func.func @transform_0(%arg0: i32) -> (i32, i32) {
    %c0_i32 = arith.constant 0 : i32
    %c0_i32_0 = arith.constant 0 : i32
    %c0_i32_1 = arith.constant 0 : i32
    return %c0_i32, %c0_i32_0 : i32, i32
  }
  func.func @transform_1(%arg0: i32) -> (i32, i32) {
    %c0_i32 = arith.constant 0 : i32
    %c0_i32_0 = arith.constant 0 : i32
    %c0_i32_1 = arith.constant 0 : i32
    return %c0_i32, %c0_i32_0 : i32, i32
  }
  func.func @transform_2(%arg0: i32) -> (i32, i32) {
    %c0_i32 = arith.constant 0 : i32
    %c0_i32_0 = arith.constant 0 : i32
    %c0_i32_1 = arith.constant 0 : i32
    return %c0_i32, %c0_i32_0 : i32, i32
  }
  func.func @transform_3(%arg0: i32) -> (i32, i32) {
    %c0_i32 = arith.constant 0 : i32
    %c0_i32_0 = arith.constant 0 : i32
    %c0_i32_1 = arith.constant 0 : i32
    return %c0_i32, %c0_i32_0 : i32, i32
  }
}

</mosaic_0001>

<bundles_post_ra>
// kernel: tpu_custom_call.1
= control target key start
LH: loop header
LB: loop body
LE: loop exit
PB: predicated region body
PF: predicated region fallthrough
CT: control target
= control target key end

     0   :  { %vm110_vm4 = vcmask 125952   ;;  %s245_s1 = inlined_call_operand.vmem [shape: f32[32,16], index: 1, kind: input, shape index: {}]   ;;  %s246_s2 = inlined_call_operand.vmem [shape: f32[32,16], index: 2, kind: input, shape index: {}]   ;;  %s247_s0 = inlined_call_operand.vmem [shape: f32[32,16], index: 0, kind: input, shape index: {}]   ;;  %s248_s3 = inlined_call_operand.vmem [shape: bf16[32,16], index: 3, kind: output, shape index: {}]  }
   0x1   :  { %v166_v0 = vld [vmem:[%s245_s1] sm:$0xff]  ;;  %v172_v2 = vld [vmem:[%s245_s1 + $0x8] sm:$0xff]  ;;  %v178_v4 = vld [vmem:[%s245_s1 + $0x10] sm:$0xff] }
   0x2   :  { %v22_v1 = vand.u32 2147483647, %v166_v0  ;;  %v23_v3 = vand.u32 2147483647, %v172_v2  ;;  %v24_v6 = vand.u32 2147483647, %v178_v4 }
   0x3   :  { %v184_v7 = vld [vmem:[%s245_s1 + $0x18] sm:$0xff]  ;;  %v18_v37 = vmax.f32 %v166_v0, 0.0  ;;  %v19_v43 = vmax.f32 %v172_v2, 0.0  ;;  %v20_v48 = vmax.f32 %v178_v4, 0.0  ;;  %v82_v51 = vld [vmem:[%s246_s2] sm:$0xff]  ;;  %v83_v57 = vld [vmem:[%s246_s2 + $0x8] sm:$0xff] }
   0x4   :  { %v26_v5 = vsub.f32 0.0, %v22_v1  ;;  %v27_v8 = vsub.f32 0.0, %v23_v3  ;;  %v25_v9 = vand.u32 2147483647, %v184_v7  ;;  %v28_v11 = vsub.f32 0.0, %v24_v6  ;;  %v78_v59 = vld [vmem:[%s247_s0] sm:$0xff] }
   0x5   :  { %v21_v58 = vmax.f32 %v184_v7, 0.0  ;;  %v84_v62 = vld [vmem:[%s246_s2 + $0x10] sm:$0xff]  ;;  %v79_v1 = vld [vmem:[%s247_s0 + $0x8] sm:$0xff]  ;;  %v85_v6 = vld [vmem:[%s246_s2 + $0x18] sm:$0xff] }
   0x6   :  { %v30_v10 = vmul.f32 1.442695, %v26_v5  ;;  %v32_v12 = vmul.f32 1.442695, %v27_v8  ;;  %v29_v13 = vsub.f32 0.0, %v25_v9  ;;  %v80_v4 = vld [vmem:[%s247_s0 + $0x10] sm:$0xff] }
   0x7   :  { %v34_v14 = vmul.f32 1.442695, %v28_v11  ;;  %v81_v11 = vld [vmem:[%s247_s0 + $0x18] sm:$0xff] }
   0x8   :  { %127 = vpow2.f32 %v30_v10  ;;  %v36_v15 = vmul.f32 1.442695, %v29_v13 }
   0x9   :  { %129 = vpow2.f32 %v32_v12 }
   0xa   :  { %131 = vpow2.f32 %v34_v14 }
   0xb   :  { %133 = vpow2.f32 %v36_v15 }
  0x12   :  { %v128_v16 = vpop.eup %127 }
  0x13   :  { %v130_v17 = vpop.eup %129  ;;  %v38_v18 = vadd.f32 1.0, %v128_v16  ;;  %v41_v23 = vmul.f32 -0.5, %v128_v16  ;;  %v44_v29 = vand.u32 2147483647, %v128_v16 }
  0x14   :  { %v132_v19 = vpop.eup %131  ;;  %v47_v20 = vadd.f32 1.0, %v130_v17  ;;  %v50_v24 = vmul.f32 -0.5, %v130_v17  ;;  %v53_v31 = vand.u32 2147483647, %v130_v17 }
  0x15   :  { %v134_v21 = vpop.eup %133  ;;  %135 = vlog2.f32 %v38_v18  ;;  %v56_v22 = vadd.f32 1.0, %v132_v19  ;;  %v59_v26 = vmul.f32 -0.5, %v132_v19  ;;  %v42_v27 = vadd.f32 1.0, %v41_v23 }
  0x16   :  { %137 = vlog2.f32 %v47_v20  ;;  %v65_v25 = vadd.f32 1.0, %v134_v21  ;;  %v68_v28 = vmul.f32 -0.5, %v134_v21  ;;  %v51_v30 = vadd.f32 1.0, %v50_v24 }
  0x17   :  { %139 = vlog2.f32 %v56_v22  ;;  %v60_v32 = vadd.f32 1.0, %v59_v26  ;;  %v62_v33 = vand.u32 2147483647, %v132_v19  ;;  %v43_v34 = vmul.f32 %v128_v16, %v42_v27 }
  0x18   :  { %141 = vlog2.f32 %v65_v25  ;;  %v69_v35 = vadd.f32 1.0, %v68_v28  ;;  %vm188_vm0 = vcmp.lt.f32.partialorder %v44_v29, 0.0004427343  ;;  %v52_v39 = vmul.f32 %v130_v17, %v51_v30 }
  0x19   :  { %v71_v40 = vand.u32 2147483647, %v134_v21  ;;  %vm193_vm1 = vcmp.lt.f32.partialorder %v53_v31, 0.0004427343  ;;  %v61_v45 = vmul.f32 %v132_v19, %v60_v32  ;;  %vm198_vm2 = vcmp.lt.f32.partialorder %v62_v33, 0.0004427343 }
  0x1a   :  { %v70_v53 = vmul.f32 %v134_v21, %v69_v35 }
  0x1b   :  { %vm72_vm3 = vcmp.lt.f32.partialorder %v71_v40, 0.0004427343 }
  0x1f   :  { %v136_v36 = vpop.eup %135 }
  0x20   :  { %v138_v41 = vpop.eup %137  ;;  %v40_v42 = vmul.f32 0.6931472, %v136_v36 }
  0x21   :  { %v140_v46 = vpop.eup %139  ;;  %v49_v47 = vmul.f32 0.6931472, %v138_v41 }
  0x22   :  { %v46_v50 = vsel %vm188_vm0, %v43_v34, %v40_v42  ;;  %v58_v52 = vmul.f32 0.6931472, %v140_v46  ;;  %v142_v54 = vpop.eup %141 }
  0x23   :  { %v74_v55 = vadd.f32 %v46_v50, %v18_v37  ;;  %v55_v56 = vsel %vm193_vm1, %v52_v39, %v49_v47  ;;  %v67_v63 = vmul.f32 0.6931472, %v142_v54 }
  0x24   :  { %v75_v60 = vadd.f32 %v55_v56, %v19_v43  ;;  %v64_v61 = vsel %vm198_vm2, %v61_v45, %v58_v52 }
  0x25   :  { %v86_v0 = vmul.f32 %v82_v51, %v74_v55  ;;  %v76_v2 = vadd.f32 %v64_v61, %v20_v48  ;;  %v73_v5 = vsel %vm72_vm3, %v70_v53, %v67_v63 }
  0x26   :  { %v87_v3 = vmul.f32 %v83_v57, %v75_v60  ;;  %v77_v9 = vadd.f32 %v73_v5, %v21_v58 }
  0x27   :  { %v90_v7 = vadd.f32 %v86_v0, %v78_v59  ;;  %v88_v8 = vmul.f32 %v84_v62, %v76_v2 }
  0x28   :  { %v91_v10 = vadd.f32 %v87_v3, %v79_v1  ;;  %v89_v14 = vmul.f32 %v85_v6, %v77_v9 }
  0x29   :  { %v123_v12 = vpack.c.bf16 %v90_v7, %v90_v7  ;;  %v92_v13 = vadd.f32 %v88_v8, %v80_v4 }
  0x2a   :  { %v124_v15 = vpack.c.bf16 %v91_v10, %v91_v10  ;;  %v93_v17 = vadd.f32 %v89_v14, %v81_v11 }
  0x2b   :  { %111 = vst.msk [vmem:[%s248_s3] sm:$0xf] %vm110_vm4, %v123_v12  ;;  %v125_v16 = vpack.c.bf16 %v92_v13, %v92_v13 }
  0x2c   :  { %112 = vst.msk [vmem:[%s248_s3 + $0x4] sm:$0xf] %vm110_vm4, %v124_v15  ;;  %v126_v18 = vpack.c.bf16 %v93_v17, %v93_v17 }
  0x2d   :  { %113 = vst.msk [vmem:[%s248_s3 + $0x8] sm:$0xf] %vm110_vm4, %v125_v16 }
  0x2e   :  { %114 = vst.msk [vmem:[%s248_s3 + $0xc] sm:$0xf] %vm110_vm4, %v126_v18 }

</bundles_post_ra>
